<compile_context>
chip_gen: v6e
topology: v6e:2x2x1
jax: 0.10.0
libtpu: 0.0.40
codegen_flags: <defaults>
</compile_context>

<pallas_src>
import jax
import jax.numpy as jnp
from jax.experimental import pallas as pl
from jax.experimental.pallas import tpu as pltpu


def _round_up(x, m):
    return (x + m - 1) // m * m


def _tensorcores_per_device():
    """Heuristic: v7x-class chips expose 2 TensorCores per device."""
    try:
        kind = jax.devices()[0].device_kind.lower()
    except Exception:
        return 1
    return 2 if "7" in kind else 1


# ----------------------------------------------------------------------------
# Weight packing: all head weights/biases into one lane-dense [R, LANE] buffer.
# ----------------------------------------------------------------------------
def pack_head_params(params, hidden, num_labels, dtype=jnp.float32):
    """Pack the 11 head weight/bias tensors into one [R, LANE] buffer.

    Returns (packed, offsets, L_pad); offsets[name] = (row_off, rows, cols) are
    STATIC Python ints used for in-kernel slicing.
    """
    H, H2 = hidden, hidden // 2
    L_pad = _round_up(num_labels, 128)
    lane = max(128, _round_up(H, 128), L_pad)

    # Lane-dense classifier output: zero-pad wc2/bc2 to L_pad columns.
    wc2_p = jnp.zeros((H2, L_pad), jnp.float32).at[:, :num_labels].set(params["wc2"])
    bc2_p = jnp.zeros((1, L_pad), jnp.float32).at[:, :num_labels].set(params["bc2"])

    blocks = [
        ("wm", params["wm"]),            # [E, H]
        ("bm", params["bm"]),            # [1, H]
        ("wa1", params["wa1"]),          # [3, H2]
        ("ba1", params["ba1"]),          # [1, H2]
        ("wa2", params["wa2"]),          # [H2, H]
        ("ba2", params["ba2"]),          # [1, H]
        ("wattn_t", params["wattn"].T),  # [1, H]   (attention vector as a row)
        ("wc1", params["wc1"]),          # [H, H2]
        ("bc1", params["bc1"]),          # [1, H2]
        ("wc2", wc2_p),                  # [H2, L_pad]
        ("bc2", bc2_p),                  # [1, L_pad]
    ]

    offsets = {}
    parts = []
    row = 0
    for name, arr in blocks:
        r, c = arr.shape
        assert c <= lane
        offsets[name] = (row, r, c)
        rp = _round_up(r, 8)  # keep every block sublane-aligned
        padded = jnp.zeros((rp, lane), dtype).at[:r, :c].set(arr.astype(dtype))
        parts.append(padded)
        row += rp
    packed = jnp.concatenate(parts, axis=0)
    return packed, offsets, L_pad


# ----------------------------------------------------------------------------
# Fused head kernel: merchant_fc + amount_fc + attention pooling + classifier.
# ----------------------------------------------------------------------------
def _make_head_kernel(w_offsets, hidden, merchant_embed):
    H, E = hidden, merchant_embed

    def kernel(w_ref, x_ref, out_ref):
        f32 = jnp.float32

        def wblk(name):
            r0, nr, nc = w_offsets[name]          # static python ints
            return w_ref[r0:r0 + nr, 0:nc].astype(f32)

        # One lane-dense activation slab per tile; static column slices.
        x = x_ref[...].astype(f32)                                  # [Tb, F_pad]
        text = x[:, 0:H]                                            # [Tb, H]
        merch_emb = x[:, H:H + E]                                   # [Tb, E]
        amt = x[:, H + E:H + E + 1]                                 # [Tb, 1]

        # --- merchant branch ------------------------------------------------
        merchant = (
            jnp.dot(merch_emb, wblk("wm"), preferred_element_type=f32)
            + wblk("bm")
        )                                                           # [Tb, H]

        # --- amount branch ----------------------------------------------------
        sign = (amt >= 0.0).astype(f32)                             # [Tb, 1]
        log_amt = jnp.log1p(jnp.abs(amt))                           # [Tb, 1]
        # amount_input = cat([amt, sign, log_amt]) -> expand the K=3 matmul
        # row-wise on the VPU (avoids a wasted full MXU pass).
        wa1 = wblk("wa1")                                           # [3, H2]
        h_amt = jnp.maximum(
            amt * wa1[0:1, :] + sign * wa1[1:2, :] + log_amt * wa1[2:3, :]
            + wblk("ba1"),
            0.0,
        )                                                           # [Tb, H2]
        amount = (
            jnp.dot(h_amt, wblk("wa2"), preferred_element_type=f32) + wblk("ba2")
        )                                                           # [Tb, H]

        # --- attention pooling: scores as VPU/XLU lane-reductions ------------
        # (shared bias battn cancels under softmax -> removed entirely)
        wattn = wblk("wattn_t")                                     # [1, H]
        s_t = jnp.sum(text * wattn, axis=-1, keepdims=True)         # [Tb, 1]
        s_m = jnp.sum(merchant * wattn, axis=-1, keepdims=True)
        s_a = jnp.sum(amount * wattn, axis=-1, keepdims=True)

        m = jnp.maximum(jnp.maximum(s_t, s_m), s_a)
        e_t = jnp.exp(s_t - m)
        e_m = jnp.exp(s_m - m)
        e_a = jnp.exp(s_a - m)
        denom = e_t + e_m + e_a                                     # exact divide
        combined = (e_t * text + e_m * merchant + e_a * amount) / denom

        # --- classifier head (dropout = identity in eval) ---------------------
        hc = jnp.maximum(
            jnp.dot(combined, wblk("wc1"), preferred_element_type=f32)
            + wblk("bc1"),
            0.0,
        )                                                           # [Tb, H2]
        logits = (
            jnp.dot(hc, wblk("wc2"), preferred_element_type=f32) + wblk("bc2")
        )                                                           # [Tb, L_pad]
        out_ref[...] = logits.astype(out_ref.dtype)

    return kernel


# ----------------------------------------------------------------------------
# Wrapper: batch-tiled, pipelined pallas_call.
# ----------------------------------------------------------------------------
def transaction_classifier_head(text_repr, merchant_emb, amount_col,
                                packed_w, w_offsets, num_labels, L_pad,
                                *, tile_b=512, io_dtype=jnp.float32,
                                core_parallel=None):
    B, H = text_repr.shape
    E = merchant_emb.shape[1]
    R, LANE = packed_w.shape
    F = H + E + 1
    F_pad = _round_up(F, 128)

    # MXU-friendly M tile (multiple of 8); default 512 per review, clamped for
    # tiny batches.  Sweep 512/1024/2048 in production.
    tile_b = _round_up(max(tile_b, 8), 8)
    tile_b = min(tile_b, _round_up(B, 8))
    B_pad = _round_up(B, tile_b)
    grid_steps = B_pad // tile_b

    # One lane-dense activation slab: [text | merchant_emb | amount] padded to
    # F_pad lanes (single input DMA stream per grid step).
    slab = jnp.concatenate(
        [text_repr, merchant_emb, amount_col], axis=1).astype(io_dtype)
    slab = jnp.pad(slab, ((0, B_pad - B), (0, F_pad - F)))

    # v7x (2 TCs/device): split the batch across cores when the grid has an
    # even number (>=2) of steps; otherwise plain PARALLEL (harmless everywhere).
    if core_parallel is None:
        core_parallel = _tensorcores_per_device() >= 2
    if core_parallel and grid_steps >= 2 and grid_steps % 2 == 0:
        sem = (pltpu.CORE_PARALLEL,)
    else:
        sem = (pltpu.PARALLEL,)

    vmem = pltpu.MemorySpace.VMEM

    out = pl.pallas_call(
        _make_head_kernel(w_offsets, H, E),
        out_shape=jax.ShapeDtypeStruct((B_pad, L_pad), io_dtype),
        grid=(grid_steps,),
        in_specs=[
            # packed weights: constant index_map -> stays resident in VMEM
            pl.BlockSpec((R, LANE), lambda i: (0, 0), memory_space=vmem),
            # batch-tiled lane-dense activation slab (pipeline double-buffered)
            pl.BlockSpec((tile_b, F_pad), lambda i: (i, 0), memory_space=vmem),
        ],
        out_specs=pl.BlockSpec((tile_b, L_pad), lambda i: (i, 0),
                               memory_space=vmem),
        compiler_params=pltpu.CompilerParams(dimension_semantics=sem),
    )(packed_w, slab)

    return out[:B, :num_labels].astype(jnp.float32)


# ----------------------------------------------------------------------------
# Parameter construction (deterministic, synthetic) + glue (embedding gathers).
# ----------------------------------------------------------------------------
def init_params(key, vocab_size, hidden, merchant_vocab, merchant_embed, num_labels):
    h2 = hidden // 2
    ks = jax.random.split(key, 16)
    std = 0.02

    def w(k, shape):
        return jax.random.normal(k, shape, jnp.float32) * std

    return {
        # transformer stub: token embedding table producing hidden-size CLS repr
        "tok_embed": w(ks[0], (vocab_size, hidden)),
        # merchant embedding table
        "merchant_embed": w(ks[1], (merchant_vocab, merchant_embed)),
        # merchant_fc (stored as [in, out])
        "wm": w(ks[2], (merchant_embed, hidden)),
        "bm": w(ks[3], (1, hidden)),
        # amount_fc: Linear(3, h2) -> ReLU -> Linear(h2, hidden)
        "wa1": w(ks[4], (3, h2)),
        "ba1": w(ks[5], (1, h2)),
        "wa2": w(ks[6], (h2, hidden)),
        "ba2": w(ks[7], (1, hidden)),
        # attention_vector: Linear(hidden, 1)
        "wattn": w(ks[8], (hidden, 1)),
        "battn": w(ks[9], (1, 1)),
        # classifier: Linear(hidden, h2) -> ReLU -> Dropout -> Linear(h2, num_labels)
        "wc1": w(ks[10], (hidden, h2)),
        "bc1": w(ks[11], (1, h2)),
        "wc2": w(ks[12], (h2, num_labels)),
        "bc2": w(ks[13], (1, num_labels)),
    }


def forward(params, packed_w, w_offsets, L_pad, num_labels,
            input_ids, attention_mask, merchant_id, amount,
            *, io_dtype=jnp.float32, tile_b=512, core_parallel=None):
    # transformer stub: last_hidden_state[:, 0, :] (CLS token embedding)
    del attention_mask  # stub encoder ignores the mask
    # Embedding gathers stay in XLA (per-row kernel DMAs would be
    # overhead-dominated; also keeps the kernel independent of table sizes).
    text_repr = jnp.take(params["tok_embed"], input_ids[:, 0], axis=0)      # [B, H]
    merchant_emb = jnp.take(params["merchant_embed"], merchant_id, axis=0)  # [B, E]
    amount_col = amount.reshape(-1, 1).astype(jnp.float32)                  # [B, 1]
    return transaction_classifier_head(
        text_repr, merchant_emb, amount_col,
        packed_w, w_offsets, num_labels, L_pad,
        tile_b=tile_b, io_dtype=io_dtype, core_parallel=core_parallel,
    )


def reference_forward(params, input_ids, attention_mask, merchant_id, amount):
    """Pure-JAX reference mirroring the PyTorch forward (eval mode)."""
    del attention_mask
    text = jnp.take(params["tok_embed"], input_ids[:, 0], axis=0)
    merchant = jnp.take(params["merchant_embed"], merchant_id, axis=0) @ params["wm"] + params["bm"]
    amt = amount.reshape(-1, 1).astype(jnp.float32)
    sign = (amt >= 0).astype(jnp.float32)
    log_amt = jnp.log(jnp.abs(amt) + 1.0)
    amount_input = jnp.concatenate([amt, sign, log_amt], axis=1)
    h = jnp.maximum(amount_input @ params["wa1"] + params["ba1"], 0.0)
    amount_repr = h @ params["wa2"] + params["ba2"]
    features = jnp.stack([text, merchant, amount_repr], axis=1)             # [B, 3, H]
    scores = jnp.einsum("bfh,ho->bfo", features, params["wattn"]) + params["battn"]
    weights = jax.nn.softmax(scores, axis=1)
    combined = jnp.sum(weights * features, axis=1)
    hc = jnp.maximum(combined @ params["wc1"] + params["bc1"], 0.0)
    return hc @ params["wc2"] + params["bc2"]


if __name__ == "__main__":
    # small, module-consistent shapes
    B, SEQ, HIDDEN = 8, 12, 32
    VOCAB, MERCHANT_VOCAB, MERCHANT_EMBED, NUM_LABELS = 100, 50, 16, 6

    key = jax.random.PRNGKey(0)
    kp, k1, k2, k3, k4, k5, k6 = jax.random.split(key, 7)

    params = init_params(kp, VOCAB, HIDDEN, MERCHANT_VOCAB, MERCHANT_EMBED, NUM_LABELS)

    # ---- Test 1: tiny batch, f32 I/O (exact path on every chip) -------------
    packed_f32, offsets, L_pad = pack_head_params(params, HIDDEN, NUM_LABELS,
                                                  dtype=jnp.float32)
    input_ids = jax.random.randint(k1, (B, SEQ), 0, VOCAB, dtype=jnp.int32)
    attention_mask = jnp.ones((B, SEQ), dtype=jnp.int32)
    merchant_id = jax.random.randint(k2, (B,), 0, MERCHANT_VOCAB, dtype=jnp.int32)
    amount = jax.random.normal(k3, (B,), jnp.float32) * 250.0  # mixed-sign amounts

    logits = forward(params, packed_f32, offsets, L_pad, NUM_LABELS,
                     input_ids, attention_mask, merchant_id, amount,
                     io_dtype=jnp.float32)
    logits = jax.block_until_ready(logits)
    ref = reference_forward(params, input_ids, attention_mask, merchant_id, amount)
    assert logits.shape == (B, NUM_LABELS)
    # Softmax denominator is now an exact divide; the remaining tolerance only
    # covers default-precision MXU matmuls (kernel) vs XLA's own dot lowering.
    assert jnp.allclose(logits, ref, atol=1e-3, rtol=1e-3), "f32 mismatch vs reference"

    # ---- Test 2: multi-step grid + batch padding + bf16 I/O (DMA-bytes path) -
    B2 = 200
    packed_bf16, offsets_b, L_pad_b = pack_head_params(params, HIDDEN, NUM_LABELS,
                                                       dtype=jnp.bfloat16)
    input_ids2 = jax.random.randint(k4, (B2, SEQ), 0, VOCAB, dtype=jnp.int32)
    attention_mask2 = jnp.ones((B2, SEQ), dtype=jnp.int32)
    merchant_id2 = jax.random.randint(k5, (B2,), 0, MERCHANT_VOCAB, dtype=jnp.int32)
    amount2 = jax.random.normal(k6, (B2,), jnp.float32) * 250.0

    logits2 = forward(params, packed_bf16, offsets_b, L_pad_b, NUM_LABELS,
                      input_ids2, attention_mask2, merchant_id2, amount2,
                      io_dtype=jnp.bfloat16, tile_b=64)   # -> grid of 4 steps
    logits2 = jax.block_until_ready(logits2)
    ref2 = reference_forward(params, input_ids2, attention_mask2, merchant_id2, amount2)
    assert logits2.shape == (B2, NUM_LABELS)
    # bf16 inputs/weights/output (math still f32 in-kernel) vs f32 reference.
    assert jnp.allclose(logits2, ref2, atol=3e-2, rtol=5e-2), "bf16 mismatch vs reference"

    print("KERNEL_OK")
</pallas_src>

<mosaic_0001>
module attributes {stable_mosaic.version = 11 : i64} {
  func.func @kernel(%arg0: i32, %arg1: memref<136x128xf32, #tpu.memory_space<vmem>>, %arg2: memref<8x128xf32, #tpu.memory_space<vmem>>, %arg3: memref<8x128xf32, #tpu.memory_space<vmem>>) attributes {dimension_semantics = [#tpu.dimension_semantics<parallel>], iteration_bounds = array<i64: 1>, scalar_prefetch = 0 : i64, scratch_operands = 0 : i64, tpu.core_type = #tpu.core_type<tc>, window_params = [{pipeline_mode = #tpu.pipeline_mode<synchronous>, transform_indices = @transform_0, window_bounds = array<i64: 136, 128>}, {transform_indices = @transform_1, window_bounds = array<i64: 8, 128>}, {transform_indices = @transform_2, window_bounds = array<i64: 8, 128>}]} {
    %c0 = arith.constant 0 : index
    %c0_0 = arith.constant 0 : index
    %0 = vector.load %arg2[%c0, %c0_0] : memref<8x128xf32, #tpu.memory_space<vmem>>, vector<8x128xf32>
    %1 = vector.extract_strided_slice %0 {offsets = [0, 0], sizes = [8, 32], strides = [1, 1]} : vector<8x128xf32> to vector<8x32xf32>
    %2 = vector.extract_strided_slice %0 {offsets = [0, 32], sizes = [8, 16], strides = [1, 1]} : vector<8x128xf32> to vector<8x16xf32>
    %3 = vector.extract_strided_slice %0 {offsets = [0, 48], sizes = [8, 1], strides = [1, 1]} : vector<8x128xf32> to vector<8x1xf32>
    %c0_1 = arith.constant 0 : index
    %c0_2 = arith.constant 0 : index
    %4 = vector.load %arg1[%c0_1, %c0_2] : memref<136x128xf32, #tpu.memory_space<vmem>>, vector<16x32xf32>
    %cst = arith.constant dense<0.000000e+00> : vector<8x32xf32>
    %5 = tpu.matmul %2, %4, %cst {dimension_numbers = #tpu.dot_dimension_numbers<[1], [0], [0], [1], [0, 0, 1, 1], [], []>} : vector<8x16xf32>, vector<16x32xf32>, vector<8x32xf32> -> vector<8x32xf32>
    %c16 = arith.constant 16 : index
    %c0_3 = arith.constant 0 : index
    %6 = vector.load %arg1[%c16, %c0_3] : memref<136x128xf32, #tpu.memory_space<vmem>>, vector<1x32xf32>
    %7 = vector.broadcast %6 : vector<1x32xf32> to vector<8x32xf32>
    %8 = arith.addf %5, %7 : vector<8x32xf32>
    %cst_4 = arith.constant 0.000000e+00 : f32
    %9 = vector.broadcast %cst_4 : f32 to vector<8x1xf32>
    %10 = arith.cmpf oge, %3, %9 : vector<8x1xf32>
    %11 = arith.extui %10 : vector<8x1xi1> to vector<8x1xi32>
    %12 = arith.sitofp %11 : vector<8x1xi32> to vector<8x1xf32>
    %13 = math.absf %3 : vector<8x1xf32>
    %14 = math.log1p %13 : vector<8x1xf32>
    %c24 = arith.constant 24 : index
    %c0_5 = arith.constant 0 : index
    %15 = vector.load %arg1[%c24, %c0_5] : memref<136x128xf32, #tpu.memory_space<vmem>>, vector<3x16xf32>
    %16 = vector.extract_strided_slice %15 {offsets = [0, 0], sizes = [1, 16], strides = [1, 1]} : vector<3x16xf32> to vector<1x16xf32>
    %17 = vector.broadcast %3 : vector<8x1xf32> to vector<8x16xf32>
    %18 = vector.broadcast %16 : vector<1x16xf32> to vector<8x16xf32>
    %19 = arith.mulf %17, %18 : vector<8x16xf32>
    %20 = vector.extract_strided_slice %15 {offsets = [1, 0], sizes = [1, 16], strides = [1, 1]} : vector<3x16xf32> to vector<1x16xf32>
    %21 = vector.broadcast %12 : vector<8x1xf32> to vector<8x16xf32>
    %22 = vector.broadcast %20 : vector<1x16xf32> to vector<8x16xf32>
    %23 = arith.mulf %21, %22 : vector<8x16xf32>
    %24 = arith.addf %19, %23 : vector<8x16xf32>
    %25 = vector.extract_strided_slice %15 {offsets = [2, 0], sizes = [1, 16], strides = [1, 1]} : vector<3x16xf32> to vector<1x16xf32>
    %26 = vector.broadcast %14 : vector<8x1xf32> to vector<8x16xf32>
    %27 = vector.broadcast %25 : vector<1x16xf32> to vector<8x16xf32>
    %28 = arith.mulf %26, %27 : vector<8x16xf32>
    %29 = arith.addf %24, %28 : vector<8x16xf32>
    %c32 = arith.constant 32 : index
    %c0_6 = arith.constant 0 : index
    %30 = vector.load %arg1[%c32, %c0_6] : memref<136x128xf32, #tpu.memory_space<vmem>>, vector<1x16xf32>
    %31 = vector.broadcast %30 : vector<1x16xf32> to vector<8x16xf32>
    %32 = arith.addf %29, %31 : vector<8x16xf32>
    %cst_7 = arith.constant 0.000000e+00 : f32
    %33 = vector.broadcast %cst_7 : f32 to vector<8x16xf32>
    %34 = arith.maximumf %32, %33 : vector<8x16xf32>
    %c40 = arith.constant 40 : index
    %c0_8 = arith.constant 0 : index
    %35 = vector.load %arg1[%c40, %c0_8] : memref<136x128xf32, #tpu.memory_space<vmem>>, vector<16x32xf32>
    %cst_9 = arith.constant dense<0.000000e+00> : vector<8x32xf32>
    %36 = tpu.matmul %34, %35, %cst_9 {dimension_numbers = #tpu.dot_dimension_numbers<[1], [0], [0], [1], [0, 0, 1, 1], [], []>} : vector<8x16xf32>, vector<16x32xf32>, vector<8x32xf32> -> vector<8x32xf32>
    %c56 = arith.constant 56 : index
    %c0_10 = arith.constant 0 : index
    %37 = vector.load %arg1[%c56, %c0_10] : memref<136x128xf32, #tpu.memory_space<vmem>>, vector<1x32xf32>
    %38 = vector.broadcast %37 : vector<1x32xf32> to vector<8x32xf32>
    %39 = arith.addf %36, %38 : vector<8x32xf32>
    %c64 = arith.constant 64 : index
    %c0_11 = arith.constant 0 : index
    %40 = vector.load %arg1[%c64, %c0_11] : memref<136x128xf32, #tpu.memory_space<vmem>>, vector<1x32xf32>
    %41 = vector.broadcast %40 : vector<1x32xf32> to vector<8x32xf32>
    %42 = arith.mulf %1, %41 : vector<8x32xf32>
    %cst_12 = arith.constant dense<0.000000e+00> : vector<8xf32>
    %43 = vector.multi_reduction <add>, %42, %cst_12 [1] : vector<8x32xf32> to vector<8xf32>
    %44 = vector.shape_cast %43 : vector<8xf32> to vector<8x1xf32>
    %45 = vector.broadcast %40 : vector<1x32xf32> to vector<8x32xf32>
    %46 = arith.mulf %8, %45 : vector<8x32xf32>
    %cst_13 = arith.constant dense<0.000000e+00> : vector<8xf32>
    %47 = vector.multi_reduction <add>, %46, %cst_13 [1] : vector<8x32xf32> to vector<8xf32>
    %48 = vector.shape_cast %47 : vector<8xf32> to vector<8x1xf32>
    %49 = vector.broadcast %40 : vector<1x32xf32> to vector<8x32xf32>
    %50 = arith.mulf %39, %49 : vector<8x32xf32>
    %cst_14 = arith.constant dense<0.000000e+00> : vector<8xf32>
    %51 = vector.multi_reduction <add>, %50, %cst_14 [1] : vector<8x32xf32> to vector<8xf32>
    %52 = vector.shape_cast %51 : vector<8xf32> to vector<8x1xf32>
    %53 = arith.maximumf %44, %48 : vector<8x1xf32>
    %54 = arith.maximumf %53, %52 : vector<8x1xf32>
    %55 = arith.subf %44, %54 : vector<8x1xf32>
    %56 = math.exp %55 : vector<8x1xf32>
    %57 = arith.subf %48, %54 : vector<8x1xf32>
    %58 = math.exp %57 : vector<8x1xf32>
    %59 = arith.subf %52, %54 : vector<8x1xf32>
    %60 = math.exp %59 : vector<8x1xf32>
    %61 = arith.addf %56, %58 : vector<8x1xf32>
    %62 = arith.addf %61, %60 : vector<8x1xf32>
    %63 = vector.broadcast %56 : vector<8x1xf32> to vector<8x32xf32>
    %64 = arith.mulf %63, %1 : vector<8x32xf32>
    %65 = vector.broadcast %58 : vector<8x1xf32> to vector<8x32xf32>
    %66 = arith.mulf %65, %8 : vector<8x32xf32>
    %67 = arith.addf %64, %66 : vector<8x32xf32>
    %68 = vector.broadcast %60 : vector<8x1xf32> to vector<8x32xf32>
    %69 = arith.mulf %68, %39 : vector<8x32xf32>
    %70 = arith.addf %67, %69 : vector<8x32xf32>
    %71 = vector.broadcast %62 : vector<8x1xf32> to vector<8x32xf32>
    %72 = arith.divf %70, %71 : vector<8x32xf32>
    %c72 = arith.constant 72 : index
    %c0_15 = arith.constant 0 : index
    %73 = vector.load %arg1[%c72, %c0_15] : memref<136x128xf32, #tpu.memory_space<vmem>>, vector<32x16xf32>
    %cst_16 = arith.constant dense<0.000000e+00> : vector<8x16xf32>
    %74 = tpu.matmul %72, %73, %cst_16 {dimension_numbers = #tpu.dot_dimension_numbers<[1], [0], [0], [1], [0, 0, 1, 1], [], []>} : vector<8x32xf32>, vector<32x16xf32>, vector<8x16xf32> -> vector<8x16xf32>
    %c104 = arith.constant 104 : index
    %c0_17 = arith.constant 0 : index
    %75 = vector.load %arg1[%c104, %c0_17] : memref<136x128xf32, #tpu.memory_space<vmem>>, vector<1x16xf32>
    %76 = vector.broadcast %75 : vector<1x16xf32> to vector<8x16xf32>
    %77 = arith.addf %74, %76 : vector<8x16xf32>
    %cst_18 = arith.constant 0.000000e+00 : f32
    %78 = vector.broadcast %cst_18 : f32 to vector<8x16xf32>
    %79 = arith.maximumf %77, %78 : vector<8x16xf32>
    %c112 = arith.constant 112 : index
    %c0_19 = arith.constant 0 : index
    %80 = vector.load %arg1[%c112, %c0_19] : memref<136x128xf32, #tpu.memory_space<vmem>>, vector<16x128xf32>
    %cst_20 = arith.constant dense<0.000000e+00> : vector<8x128xf32>
    %81 = tpu.matmul %79, %80, %cst_20 {dimension_numbers = #tpu.dot_dimension_numbers<[1], [0], [0], [1], [0, 0, 1, 1], [], []>} : vector<8x16xf32>, vector<16x128xf32>, vector<8x128xf32> -> vector<8x128xf32>
    %c128 = arith.constant 128 : index
    %c0_21 = arith.constant 0 : index
    %82 = vector.load %arg1[%c128, %c0_21] : memref<136x128xf32, #tpu.memory_space<vmem>>, vector<1x128xf32>
    %83 = vector.broadcast %82 : vector<1x128xf32> to vector<8x128xf32>
    %84 = arith.addf %81, %83 : vector<8x128xf32>
    %c0_22 = arith.constant 0 : index
    %c0_23 = arith.constant 0 : index
    %85 = vector.load %arg3[%c0_22, %c0_23] : memref<8x128xf32, #tpu.memory_space<vmem>>, vector<8x128xf32>
    tpu.vector_store %arg3[%c0_22, %c0_23], %84 {strides = array<i32>} : memref<8x128xf32, #tpu.memory_space<vmem>>, vector<8x128xf32>,
    return
  }
  func.func @transform_0(%arg0: i32) -> (i32, i32) {
    %c0_i32 = arith.constant 0 : i32
    %c0_i32_0 = arith.constant 0 : i32
    %c0_i32_1 = arith.constant 0 : i32
    return %c0_i32, %c0_i32_0 : i32, i32
  }
  func.func @transform_1(%arg0: i32) -> (i32, i32) {
    %c0_i32 = arith.constant 0 : i32
    %c0_i32_0 = arith.constant 0 : i32
    return %arg0, %c0_i32 : i32, i32
  }
  func.func @transform_2(%arg0: i32) -> (i32, i32) {
    %c0_i32 = arith.constant 0 : i32
    %c0_i32_0 = arith.constant 0 : i32
    return %arg0, %c0_i32 : i32, i32
  }
}

</mosaic_0001>

<bundles_post_ra>
// kernel: tpu_custom_call.1
= control target key start
LH: loop header
LB: loop body
LE: loop exit
PB: predicated region body
PF: predicated region fallthrough
CT: control target
= control target key end

     0   :  { %7 = vsyncpa [#allocation3], 0  ;;  %s683_s0 = inlined_call_operand.hbm [shape: f32[136,128], index: 0, kind: input, shape index: {}]   ;;  %s684_s1 = inlined_call_operand.hbm [shape: f32[8,128], index: 1, kind: input, shape index: {}]   ;;  %s685_s2 = inlined_call_operand.hbm [shape: f32[8,128], index: 2, kind: output, shape index: {}]  }
   0x1   :  { %8 = vsyncpa [#allocation6], 0 }
   0x2   :  { %9 = vsyncpa [#allocation4], 0  ;;  %s616_s9 = smov [#allocation2]  }
   0x3   :  { %s15_s10 = sshll.u32 %s616_s9, 4  ;;  %s16_s10 = int_to_ptr.vmem [resolvable:$true] %s15_s10 }
   0x4   :  { %s558_s11 = scalar_lea.vmem %s16_s10, 2176  ;;  %p563_p1 = scmp.lt.s32.totalorder %s16_s10, %s16_s10 }
   0x5   :  { %p559_p0 = scmp.ne.s32.totalorder %s16_s10, %s558_s11  ;;  %p564_p2 = scmp.lt.s32.totalorder %s558_s11, %s558_s11 }
   0x7   :  { %p565_p3 = por %p564_p2, %p563_p1 }
   0x9   :  { %p566_p4 = pnand %p565_p3, %p559_p0 }
   0xb   :  { %569 = shalt.err (!%p566_p4)
}
   0xc   :  { %s617_s12 = smov 128   ;;  %s618_s13 = smov 8  }
   0xd   :  { %21 = dma.hbm_to_vmem [thread:$0]  %s683_s0, 2176, %s16_s10, [#allocation3], %s617_s12, %s617_s12, %s618_s13  }
   0xe   :  { %s619_s16 = smov [#allocation5]  }
   0xf   :  { %s28_s17 = sshll.u32 %s619_s16, 4  ;;  %s29_s17 = int_to_ptr.vmem [resolvable:$true] %s28_s17 }
  0x10   :  { %s578_s18 = scalar_lea.vmem %s29_s17, 128  ;;  %p583_p6 = scmp.lt.s32.totalorder %s29_s17, %s29_s17 }
  0x11   :  { %p579_p5 = scmp.ne.s32.totalorder %s29_s17, %s578_s18  ;;  %p584_p7 = scmp.lt.s32.totalorder %s578_s18, %s578_s18 }
  0x13   :  { %p585_p8 = por %p584_p7, %p583_p6 }
  0x15   :  { %p586_p9 = pnand %p585_p8, %p579_p5 }
  0x17   :  { %589 = shalt.err (!%p586_p9)
}
  0x18   :  { %31 = dma.hbm_to_vmem [thread:$0]  %s684_s1, 128, %s29_s17, [#allocation6]  }
  0x19   :  { %610 = dma.done.wait [#allocation3], 2176  }
  0x1a   :  { %611 = vsyncadd [#allocation3], 4294965120 }
  0x1b   :  { %612 = dma.done.wait [#allocation6], 128  }
  0x1c   :  { %613 = vsyncadd [#allocation6], 4294967168  ;;  %v620_v0 = vmov 48   ;;  %v621_v1 = vmov 0.0   ;;  %v648_v2 = vld [vmem:[#allocation5] sm:$0xff]  ;;  %v39_v12 = vld [vmem:[#allocation2] sm:$0xff]  ;;  %v140_v16 = vlaneseq }
  0x1d   :  { %538 = vset.pattern.permute.xlu0 %v620_v0  ;;  %539 = vset.pattern.permute.xlu1 %v620_v0  ;;  %vm122_vm0 = vcmp.ge.f32.partialorder %v648_v2, 0.0  ;;  %v125_v3 = vand.u32 2147483647, %v648_v2  ;;  %v40_v10 = vld [vmem:[#allocation2 + $0x8] sm:$0xff]  ;;  %vm622_vm2 = vmmov 0   ;;  %v175_v14 = vld [vmem:[#allocation2 + $0x30] sm:$0xff] }
  0x1e   :  { %497 = vmatprep.subr.mxu0 %v621_v1  ;;  %504 = vmatprep.subr.mxu1 %v621_v1  ;;  %v474_v4 = vsel %vm122_vm0, 1.0, %v621_v1  ;;  %v174_v15 = vld [vmem:[#allocation2 + $0x28] sm:$0xff]  ;;  %s623_s0 = smov 96   ;;  %v141_v17 = vshrl.u32 %v140_v16, 7  ;;  %v135_v21 = vld [vmem:[#allocation2 + $0x18] sm:$0x7] }
  0x1f   :  { %137 = vperm.xlu0 %538, %v648_v2   ;;  %v126_v5 = vadd.f32 1.0, %v125_v3  ;;  %v129_v6 = vmul.f32 -0.5, %v125_v3  ;;  %vm133_vm1 = vcmp.lt.f32.partialorder %v125_v3, 0.0004427343  ;;  %498 = vmatpush3.msra.mxu0 %v40_v10  ;;  %v475_v32 = vld [vmem:[#allocation2 + $0x20] ss:$0 sm:$0xff] }
  0x20   :  { %499 = vmatprep.subr.mxu0 %v621_v1  ;;  %501 = vmatprep.mubr.msk.f32.mxu0 %vm622_vm2, %v621_v1  ;;  %v142_v19 = vsub.s32 0, %v141_v17  ;;  %v152_v20 = vsub.s32 1, %v141_v17  ;;  %v163_v24 = vsub.s32 2, %v141_v17  ;;  %vm49_vm3 = vcmask 130048   ;;  %v478_v37 = vld [vmem:[#allocation2 + $0x40] ss:$0 sm:$0xff] }
  0x21   :  { %540 = vlog2.f32 %v126_v5  ;;  %v130_v7 = vadd.f32 1.0, %v129_v6  ;;  %500 = vmatpush3.msra.mxu0 %v39_v12  ;;  %508 = vmatprep.mubr.msk.f32.mxu1 %vm622_vm2, %v621_v1  ;;  %v259_v38 = vmul.f32 %v478_v37, %v648_v2  ;;  %vm260_vm4 = vcmask 261120   ;;  %v472_v40 = vld [vmem:[#allocation2 + $0x10] ss:$0 sm:$0xff]  ;;  %v476_v44 = vld [vmem:[#allocation2 + $0x38] ss:$0 sm:$0xff] }
  0x22   :  { %505 = vmatpush3.msra.mxu1 %v175_v14  ;;  %511 = vmatprep.subr.mxu0 %v621_v1  ;;  %v143_v22 = vrot.slane %v135_v21, %v142_v19  ;;  %v153_v23 = vrot.slane %v135_v21, %v152_v20  ;;  %v164_v28 = vrot.slane %v135_v21, %v163_v24  ;;  %v295_v52 = vld [vmem:[#allocation2 + $0x60] sm:$0xff]  ;;  %v294_v53 = vld [vmem:[#allocation2 + $0x58] sm:$0xff]  ;;  %v293_v54 = vld [vmem:[#allocation2 + $0x50] sm:$0xff]  ;;  %s624_s1 = smov [#allocation7]  }
  0x23   :  { %147 = vperm.xlu0 %538, %v474_v4   ;;  %v131_v8 = vmul.f32 %v130_v7, %v125_v3  ;;  %506 = vmatprep.subr.mxu1 %v621_v1  ;;  %v261_v39 = vsel %vm260_vm4, %v259_v38, 0.0  ;;  %v292_v55 = vld [vmem:[#allocation2 + $0x48] sm:$0xff]  ;;  %v376_v17 = vld [vmem:[#allocation2 + $0x78] sm:$0xff]  ;;  %s462_s21 = sshll.u32 %s624_s1, 4  ;;  %s463_s21 = int_to_ptr.vmem [resolvable:$true] %s462_s21 }
  0x24   :  { %507 = vmatpush3.msra.mxu1 %v174_v15  ;;  %v479_v19 = vld [vmem:[#allocation2 + $0x68] ss:$0 sm:$0xff]  ;;  %s590_s22 = scalar_lea.vmem %s463_s21, 128  ;;  %p595_p11 = scmp.lt.s32.totalorder %s463_s21, %s463_s21 }
  0x25   :  { %522 = vmatprep.subr.mxu1 %v621_v1  ;;  %p591_p10 = scmp.ne.s32.totalorder %s463_s21, %s590_s22  ;;  %p596_p12 = scmp.lt.s32.totalorder %s590_s22, %s590_s22 }
  0x27   :  { %p597_p13 = por %p596_p12, %p595_p11 }
  0x29   :  { %p598_p0 = pnand %p597_p13, %p591_p10 }
  0x2e   :  { %v541_v9 = vpop.eup %540 }
  0x2f   :  { %v128_v11 = vmul.f32 0.6931472, %v541_v9 }
  0x31   :  { %v134_v13 = vsel %vm133_vm1, %v131_v8, %v128_v11 }
  0x32   :  { %158 = vperm.xlu1 %539, %v134_v13  }
  0x36   :  { %47 = vrot.lane.b32.xlu1 %v648_v2, %s623_s0 }
  0x42   :  { %262 = vadd.xlane.f32.xlu0 %v261_v39 }
  0x9a   :  { %v138_v18 = vpop.permute.xlu0 %137 }
  0x9b   :  { %v144_v26 = vmul.f32 %v143_v22, %v138_v18  ;;  %v375_v18 = vld [vmem:[#allocation2 + $0x70] sm:$0xff] }
  0x9e   :  { %v148_v25 = vpop.permute.xlu0 %147 }
  0x9f   :  { %v154_v27 = vmul.f32 %v153_v23, %v148_v25 }
  0xa1   :  { %v155_v30 = vadd.f32 %v154_v27, %v144_v26 }
  0xad   :  { %v159_v29 = vpop.permute.xlu1 %158 }
  0xae   :  { %v165_v31 = vmul.f32 %v164_v28, %v159_v29 }
  0xb0   :  { %v166_v33 = vadd.f32 %v165_v31, %v155_v30 }
  0xb1   :  { %v48_v34 = vpop.permute.xlu1 %47 }
  0xb2   :  { %v172_v35 = vadd.f32 %v475_v32, %v166_v33  ;;  %502 = vmatmul.mubr.msk.f32.vlgmr.msra.gmra.mxu0 %vm49_vm3, %v48_v34 }
  0xb3   :  { %519 = vmatprep.mubr.msk.f32.mxu0 %vm622_vm2, %v621_v1  ;;  %512 = vmatpush3.msra.mxu0 %v295_v52 }
  0xb4   :  { %v173_v36 = vmax.f32 %v172_v35, 0.0  ;;  %513 = vmatprep.subr.mxu0 %v621_v1 }
  0xb5   :  { %514 = vmatpush3.msra.mxu0 %v294_v53 }
  0xb6   :  { %509 = vmatmul.mubr.msk.f32.vlgmr.msra.gmra.mxu1 %vm49_vm3, %v173_v36  ;;  %515 = vmatprep.subr.mxu0 %v621_v1 }
  0xb7   :  { %526 = vmatprep.mubr.msk.f32.mxu1 %vm622_vm2, %v621_v1  ;;  %516 = vmatpush3.msra.mxu0 %v293_v54 }
  0xb8   :  { %517 = vmatprep.subr.mxu0 %v621_v1  ;;  %523 = vmatpush3.msra.mxu1 %v376_v17 }
  0xb9   :  { %518 = vmatpush3.msra.mxu0 %v292_v55  ;;  %524 = vmatprep.subr.mxu1 %v621_v1 }
  0xba   :  { %525 = vmatpush3.msra.mxu1 %v375_v18 }
  0xcb   :  { %v263_v56 = vpop.xlane.xlu0 %262 }
 0x172   :  { %v118_v41 = vpop.f32.mrf.mxu0 }
 0x173   :  { %v119_v42 = vadd.f32 %v472_v40, %v118_v41 }
 0x174   :  { %v503_v43 = vpop.f32.mrf.mxu0 }
 0x175   :  { %v264_v45 = vmul.f32 %v478_v37, %v119_v42 }
 0x176   :  { %v250_v46 = vpop.f32.mrf.mxu1 }
 0x177   :  { %v251_v47 = vadd.f32 %v476_v44, %v250_v46  ;;  %v265_v48 = vsel %vm260_vm4, %v264_v45, 0.0 }
 0x178   :  { %266 = vadd.xlane.f32.xlu1 %v265_v48  ;;  %v510_v49 = vpop.f32.mrf.mxu1 }
 0x179   :  { %v268_v50 = vmul.f32 %v478_v37, %v251_v47 }
 0x17b   :  { %v269_v51 = vsel %vm260_vm4, %v268_v50, 0.0 }
 0x17c   :  { %270 = vadd.xlane.f32.xlu0 %v269_v51 }
 0x201   :  { %v267_v57 = vpop.xlane.xlu1 %266 }
 0x202   :  { %v272_v58 = vmax.f32 %v263_v56, %v267_v57 }
 0x205   :  { %v271_v59 = vpop.xlane.xlu0 %270 }
 0x206   :  { %v273_v60 = vmax.f32 %v272_v58, %v271_v59 }
 0x208   :  { %v274_v61 = vsub.f32 %v263_v56, %v273_v60  ;;  %v277_v62 = vsub.f32 %v267_v57, %v273_v60  ;;  %v280_v63 = vsub.f32 %v271_v59, %v273_v60 }
 0x20a   :  { %v275_v0 = vmul.f32 1.442695, %v274_v61  ;;  %v278_v3 = vmul.f32 1.442695, %v277_v62  ;;  %v281_v4 = vmul.f32 1.442695, %v280_v63 }
 0x20c   :  { %542 = vpow2.f32 %v275_v0 }
 0x20d   :  { %544 = vpow2.f32 %v278_v3 }
 0x20e   :  { %546 = vpow2.f32 %v281_v4 }
 0x219   :  { %v543_v5 = vpop.eup %542 }
 0x21a   :  { %v545_v6 = vpop.eup %544  ;;  %v285_v10 = vmul.f32 %v543_v5, %v648_v2  ;;  %v481_v2 = vld [vmem:[#allocation2 + $0x80] ss:$0 sm:$0xff] }
 0x21b   :  { %v283_v7 = vadd.f32 %v545_v6, %v543_v5  ;;  %v547_v8 = vpop.eup %546  ;;  %v286_v11 = vmul.f32 %v545_v6, %v119_v42 }
 0x21c   :  { %v288_v13 = vmul.f32 %v547_v8, %v251_v47 }
 0x21d   :  { %v284_v9 = vadd.f32 %v547_v8, %v283_v7  ;;  %v287_v12 = vadd.f32 %v286_v11, %v285_v10 }
 0x21f   :  { %548 = vrcp.f32 %v284_v9  ;;  %v289_v14 = vadd.f32 %v288_v13, %v287_v12 }
 0x22c   :  { %v549_v15 = vpop.eup %548 }
 0x22d   :  { %v291_v16 = vmul.f32 %v549_v15, %v289_v14 }
 0x22f   :  { %520 = vmatmul.mubr.msk.f32.vlgmr.msra.gmra.mxu0 %vm260_vm4, %v291_v16 }
 0x2ef   :  { %v370_v20 = vpop.f32.mrf.mxu0 }
 0x2f0   :  { %v371_v21 = vadd.f32 %v479_v19, %v370_v20 }
 0x2f1   :  { %v521_v22 = vpop.f32.mrf.mxu0 }
 0x2f2   :  { %v374_v23 = vmax.f32 %v371_v21, 0.0 }
 0x2f4   :  { %527 = vmatmul.mubr.msk.f32.vlgmr.msra.gmra.mxu1 %vm49_vm3, %v374_v23 }
 0x3b4   :  { %v451_v24 = vpop.f32.mrf.mxu1 }
 0x3b5   :  { %v452_v25 = vadd.f32 %v481_v2, %v451_v24 }
 0x3b6   :  { %v528_v26 = vpop.f32.mrf.mxu1 }
 0x3b7   :  { %455 = vst [vmem:[#allocation7] sm:$0xff] %v452_v25 }
 0x3b8   :  { %601 = shalt.err (!%p598_p0)
}
 0x3b9   :  { %465 = dma.vmem_to_hbm [thread:$0]  %s463_s21, 128, %s685_s2, [#allocation4]  }
 0x3ba   :  { %614 = dma.done.wait [#allocation4], 128  }
 0x3bb   :  { %615 = vsyncadd [#allocation4], 4294967168 }
 0x3bc   :  { %469 = vsyncpa [#allocation3], 1 }
 0x3bd   :  { %470 = vsyncpa [#allocation6], 1 }
 0x3be   :  { %471 = vsyncpa [#allocation4], 1 }

</bundles_post_ra>
